<compile_context>
chip_gen: v7x
topology: tpu7x:2x2x1
jax: 0.10.0
libtpu: 0.0.40
codegen_flags: <defaults>
</compile_context>

<pallas_src>
import functools

import jax
import jax.numpy as jnp
import numpy as np
from jax import lax
from jax.experimental import pallas as pl
from jax.experimental.pallas import tpu as pltpu


# ------------------------- Pallas kernel ------------------------------------
def ensemble_mlp_kernel(state_tiled_ref, action_ref,
                        w1s_ref, w1a_ref, b1_ref,
                        w2_ref, b2_ref,
                        w3_ref, b3_ref,
                        w4_ref, b4_ref,
                        out_ref, *, n_euler_steps: int):
    """One batch tile, all E ensemble members, in a single invocation.

    state_tiled: (TB, E*S)   state replicated per member along lanes
    action:      (TB, A)
    w1s:         (E*S, E*H)  block-diagonal (state slice of layer-1 weight)
    w1a:         (A,   E*H)  ensemble-wide  (action slice of layer-1 weight)
    w2, w3:      (E*H, E*H)  block-diagonal
    w4:          (E*H, E*S)  block-diagonal
    biases:      (1, E*H) / (1, E*S)   (always f32)
    out:         (TB, E*S)   lane-dense slab; wrapper reshapes to (E, B, S)
    """
    dot_dtype = w2_ref.dtype                                   # bf16 or f32
    next_state = state_tiled_ref[...].astype(jnp.float32)      # (TB, E*S), carried in f32
    action = action_ref[...].astype(dot_dtype)                 # (TB, A)

    w1s = w1s_ref[...]
    w1a = w1a_ref[...]
    w2 = w2_ref[...]
    w3 = w3_ref[...]
    w4 = w4_ref[...]

    TB = next_state.shape[0]
    EH = w2.shape[1]
    ES = w4.shape[1]

    # Hoisted out of the Euler loop: action's layer-1 contribution is constant
    # across steps, and bias broadcasts are materialized exactly once.
    const1 = (jnp.dot(action, w1a, preferred_element_type=jnp.float32)
              + b1_ref[...])                                    # (TB, E*H)
    b2 = jnp.broadcast_to(b2_ref[...], (TB, EH))
    b3 = jnp.broadcast_to(b3_ref[...], (TB, EH))
    b4 = jnp.broadcast_to(b4_ref[...], (TB, ES))

    step_size = jnp.float32(1.0 / n_euler_steps)

    def euler_step(_, ns):
        h = jnp.tanh(jnp.dot(ns.astype(dot_dtype), w1s,
                             preferred_element_type=jnp.float32) + const1)
        h = jnp.tanh(jnp.dot(h.astype(dot_dtype), w2,
                             preferred_element_type=jnp.float32) + b2)
        h = jnp.tanh(jnp.dot(h.astype(dot_dtype), w3,
                             preferred_element_type=jnp.float32) + b3)
        delta = jnp.dot(h.astype(dot_dtype), w4,
                        preferred_element_type=jnp.float32) + b4
        return ns + step_size * delta

    if n_euler_steps <= 16:
        # tiny trip count: full static unroll lets MXU pushes of step i+1
        # interleave with the EUP tanh tail of step i.
        for _ in range(n_euler_steps):
            next_state = euler_step(0, next_state)
    else:
        next_state = lax.fori_loop(0, n_euler_steps, euler_step, next_state,
                                   unroll=4)

    out_ref[...] = next_state.astype(out_ref.dtype)


# ------------------------- weight packing (call ONCE at init) ---------------
def _block_diag(blocks):
    """(E, r, c) stacked per-member weights -> (E*r, E*c) block-diagonal."""
    E, r, c = blocks.shape
    eye = jnp.eye(E, dtype=blocks.dtype)
    return jnp.einsum("ef,erc->erfc", eye, blocks).reshape(E * r, E * c)


def pack_params(params, weight_dtype=jnp.bfloat16):
    """Pack raw per-member parameters into the kernel layout.

    Call once at init / parameter-update time, NOT per forward."""
    w1s, w1a, b1 = params["w1s"], params["w1a"], params["b1"]
    w2, b2 = params["w2"], params["b2"]
    w3, b3 = params["w3"], params["b3"]
    w4, b4 = params["w4"], params["b4"]
    E, S, H = w1s.shape
    A = w1a.shape[1]
    packed = dict(
        w1s=_block_diag(w1s).astype(weight_dtype),                          # (E*S, E*H)
        w1a=jnp.transpose(w1a, (1, 0, 2)).reshape(A, E * H).astype(weight_dtype),
        b1=b1.reshape(1, E * H).astype(jnp.float32),
        w2=_block_diag(w2).astype(weight_dtype),
        b2=b2.reshape(1, E * H).astype(jnp.float32),
        w3=_block_diag(w3).astype(weight_dtype),
        b3=b3.reshape(1, E * H).astype(jnp.float32),
        w4=_block_diag(w4).astype(weight_dtype),                            # (E*H, E*S)
        b4=b4.reshape(1, E * S).astype(jnp.float32),
    )
    return jax.tree_util.tree_map(jnp.asarray, packed)


def _round_up(x, m):
    return (x + m - 1) // m * m


# ------------------------- forward (jitted; packing NOT in this path) --------
@functools.partial(jax.jit, static_argnames=("n_euler_steps", "model_idx"))
def state_predictor_forward(state, action, packed, n_euler_steps=1, model_idx=None):
    """Equivalent of StatePredictor.forward(state, action, n_euler_steps).

    Returns (ensemble_size, batch, state_dim); if model_idx is given, (batch, state_dim)."""
    B, S = state.shape
    A = action.shape[1]
    ES = packed["w4"].shape[1]
    EH = packed["w2"].shape[1]
    E = ES // S

    # Batch tiling: sublane-aligned tile, capped at 256 rows (MXU-friendly,
    # keeps VMEM per block tiny on all generations incl. v7x's 64 MiB).
    TB = min(256, _round_up(B, 8))
    Bp = _round_up(B, TB)
    pad = Bp - B
    if pad:
        state_p = jnp.pad(state, ((0, pad), (0, 0)))
        action_p = jnp.pad(action, ((0, pad), (0, 0)))
    else:
        state_p, action_p = state, action

    state_tiled = jnp.tile(state_p, (1, E))                     # (Bp, E*S)

    kernel = functools.partial(ensemble_mlp_kernel, n_euler_steps=n_euler_steps)

    resident = lambda shape: pl.BlockSpec(shape, lambda i: (0, 0))  # grid-resident

    out_flat = pl.pallas_call(
        kernel,
        out_shape=jax.ShapeDtypeStruct((Bp, ES), jnp.float32),
        grid_spec=pltpu.PrefetchScalarGridSpec(
            num_scalar_prefetch=0,
            grid=(Bp // TB,),
            in_specs=[
                pl.BlockSpec((TB, ES), lambda i: (i, 0)),       # state_tiled
                pl.BlockSpec((TB, A), lambda i: (i, 0)),        # action
                resident((S * E, EH)),                          # w1s
                resident((A, EH)),                              # w1a
                resident((1, EH)),                              # b1
                resident((EH, EH)),                             # w2
                resident((1, EH)),                              # b2
                resident((EH, EH)),                             # w3
                resident((1, EH)),                              # b3
                resident((EH, ES)),                             # w4
                resident((1, ES)),                              # b4
            ],
            out_specs=pl.BlockSpec((TB, ES), lambda i: (i, 0)),
        ),
        compiler_params=pltpu.CompilerParams(
            # batch tiles are independent -> shard across TCs on v7x megacore
            dimension_semantics=("parallel",),
        ),
    )(state_tiled, action_p,
      packed["w1s"], packed["w1a"], packed["b1"],
      packed["w2"], packed["b2"],
      packed["w3"], packed["b3"],
      packed["w4"], packed["b4"])

    out = out_flat[:B].reshape(B, E, S).transpose(1, 0, 2)      # (E, B, S)
    if model_idx is not None:
        return out[model_idx]
    return out


def predict_mean(state, action, packed, n_euler_steps=1):
    return jnp.mean(
        state_predictor_forward(state, action, packed, n_euler_steps=n_euler_steps),
        axis=0)


# ------------------------- deterministic parameter init ---------------------
def init_params(key, state_dim, action_dim, hidden_dim, ensemble_size):
    """Synthetic deterministic init (uniform +-1/sqrt(fan_in), PyTorch-style bounds).

    Weights are stored as (in, out) per member so the kernel does x @ W + b."""
    def uni(k, shape, fan_in):
        bound = 1.0 / np.sqrt(fan_in)
        return jax.random.uniform(k, shape, jnp.float32, -bound, bound)

    in1 = state_dim + action_dim
    keys = jax.random.split(key, 8)
    w1 = uni(keys[0], (ensemble_size, in1, hidden_dim), in1)
    return {
        "w1s": w1[:, :state_dim, :],
        "w1a": w1[:, state_dim:, :],
        "b1": uni(keys[1], (ensemble_size, 1, hidden_dim), in1),
        "w2": uni(keys[2], (ensemble_size, hidden_dim, hidden_dim), hidden_dim),
        "b2": uni(keys[3], (ensemble_size, 1, hidden_dim), hidden_dim),
        "w3": uni(keys[4], (ensemble_size, hidden_dim, hidden_dim), hidden_dim),
        "b3": uni(keys[5], (ensemble_size, 1, hidden_dim), hidden_dim),
        "w4": uni(keys[6], (ensemble_size, hidden_dim, state_dim), hidden_dim),
        "b4": uni(keys[7], (ensemble_size, 1, state_dim), hidden_dim),
    }


# ------------------------- pure-JAX reference (for sanity) ------------------
def reference_forward(state, action, params, n_euler_steps=1):
    preds = []
    E = params["w1s"].shape[0]
    for e in range(E):
        next_state = state
        step = 1.0 / n_euler_steps
        for _ in range(n_euler_steps):
            sa1 = next_state @ params["w1s"][e] + action @ params["w1a"][e]
            h = jnp.tanh(sa1 + params["b1"][e])
            h = jnp.tanh(h @ params["w2"][e] + params["b2"][e])
            h = jnp.tanh(h @ params["w3"][e] + params["b3"][e])
            delta = h @ params["w4"][e] + params["b4"][e]
            next_state = step * delta + next_state
        preds.append(next_state)
    return jnp.stack(preds, axis=0)


# ------------------------- main ----------------------------------------------
if __name__ == "__main__":
    # Hopper-like dims, kept small.
    BATCH, STATE_DIM, ACTION_DIM = 8, 11, 3
    HIDDEN_DIM, ENSEMBLE_SIZE, N_EULER = 32, 3, 2

    key = jax.random.PRNGKey(0)
    k_params, k_state, k_action = jax.random.split(key, 3)

    params = init_params(k_params, STATE_DIM, ACTION_DIM, HIDDEN_DIM, ENSEMBLE_SIZE)
    state = jax.random.normal(k_state, (BATCH, STATE_DIM), jnp.float32)
    action = jax.random.normal(k_action, (BATCH, ACTION_DIM), jnp.float32)

    # Pack ONCE (not per forward); bf16 weights for the MXU fast path and an
    # f32 copy for a tight-tolerance semantic check.
    packed_bf16 = jax.block_until_ready(pack_params(params, jnp.bfloat16))
    packed_f32 = jax.block_until_ready(pack_params(params, jnp.float32))

    ref = reference_forward(state, action, params, n_euler_steps=N_EULER)

    # f32-weight path: exact forward semantics (tight tolerance).
    out_f32 = jax.block_until_ready(
        state_predictor_forward(state, action, packed_f32, n_euler_steps=N_EULER))
    np.testing.assert_allclose(np.asarray(out_f32), np.asarray(ref),
                               rtol=1e-4, atol=1e-4)

    # bf16-weight path: production fast path (looser tolerance).
    out_bf16 = jax.block_until_ready(
        state_predictor_forward(state, action, packed_bf16, n_euler_steps=N_EULER))
    np.testing.assert_allclose(np.asarray(out_bf16), np.asarray(ref),
                               rtol=2e-2, atol=2e-2)

    mean = jax.block_until_ready(predict_mean(state, action, packed_bf16, N_EULER))
    np.testing.assert_allclose(np.asarray(mean), np.asarray(ref.mean(0)),
                               rtol=2e-2, atol=2e-2)

    single = jax.block_until_ready(
        state_predictor_forward(state, action, packed_bf16,
                                n_euler_steps=N_EULER, model_idx=1))
    np.testing.assert_allclose(np.asarray(single), np.asarray(ref[1]),
                               rtol=2e-2, atol=2e-2)

    assert out_bf16.shape == (ENSEMBLE_SIZE, BATCH, STATE_DIM)
    print("KERNEL_OK")
</pallas_src>

<mosaic_0001>
module attributes {stable_mosaic.version = 11 : i64} {
  func.func @ensemble_mlp_kernel(%arg0: i32, %arg1: memref<8x33xf32, #tpu.memory_space<vmem>>, %arg2: memref<8x3xf32, #tpu.memory_space<vmem>>, %arg3: memref<33x96xf32, #tpu.memory_space<vmem>>, %arg4: memref<3x96xf32, #tpu.memory_space<vmem>>, %arg5: memref<1x96xf32, #tpu.memory_space<vmem>>, %arg6: memref<96x96xf32, #tpu.memory_space<vmem>>, %arg7: memref<1x96xf32, #tpu.memory_space<vmem>>, %arg8: memref<96x96xf32, #tpu.memory_space<vmem>>, %arg9: memref<1x96xf32, #tpu.memory_space<vmem>>, %arg10: memref<96x33xf32, #tpu.memory_space<vmem>>, %arg11: memref<1x33xf32, #tpu.memory_space<vmem>>, %arg12: memref<8x33xf32, #tpu.memory_space<vmem>>) attributes {dimension_semantics = [#tpu.dimension_semantics<parallel>], iteration_bounds = array<i64: 1>, scalar_prefetch = 0 : i64, scratch_operands = 0 : i64, tpu.core_type = #tpu.core_type<tc>, window_params = [{transform_indices = @transform_0, window_bounds = array<i64: 8, 33>}, {transform_indices = @transform_1, window_bounds = array<i64: 8, 3>}, {pipeline_mode = #tpu.pipeline_mode<synchronous>, transform_indices = @transform_2, window_bounds = array<i64: 33, 96>}, {pipeline_mode = #tpu.pipeline_mode<synchronous>, transform_indices = @transform_3, window_bounds = array<i64: 3, 96>}, {pipeline_mode = #tpu.pipeline_mode<synchronous>, transform_indices = @transform_4, window_bounds = array<i64: 1, 96>}, {pipeline_mode = #tpu.pipeline_mode<synchronous>, transform_indices = @transform_5, window_bounds = array<i64: 96, 96>}, {pipeline_mode = #tpu.pipeline_mode<synchronous>, transform_indices = @transform_6, window_bounds = array<i64: 1, 96>}, {pipeline_mode = #tpu.pipeline_mode<synchronous>, transform_indices = @transform_7, window_bounds = array<i64: 96, 96>}, {pipeline_mode = #tpu.pipeline_mode<synchronous>, transform_indices = @transform_8, window_bounds = array<i64: 1, 96>}, {pipeline_mode = #tpu.pipeline_mode<synchronous>, transform_indices = @transform_9, window_bounds = array<i64: 96, 33>}, {pipeline_mode = #tpu.pipeline_mode<synchronous>, transform_indices = @transform_10, window_bounds = array<i64: 1, 33>}, {transform_indices = @transform_11, window_bounds = array<i64: 8, 33>}]} {
    %c0 = arith.constant 0 : index
    %c0_0 = arith.constant 0 : index
    %0 = vector.load %arg1[%c0, %c0_0] : memref<8x33xf32, #tpu.memory_space<vmem>>, vector<8x33xf32>
    %c0_1 = arith.constant 0 : index
    %c0_2 = arith.constant 0 : index
    %1 = vector.load %arg2[%c0_1, %c0_2] : memref<8x3xf32, #tpu.memory_space<vmem>>, vector<8x3xf32>
    %c0_3 = arith.constant 0 : index
    %c0_4 = arith.constant 0 : index
    %2 = vector.load %arg3[%c0_3, %c0_4] : memref<33x96xf32, #tpu.memory_space<vmem>>, vector<33x96xf32>
    %c0_5 = arith.constant 0 : index
    %c0_6 = arith.constant 0 : index
    %3 = vector.load %arg4[%c0_5, %c0_6] : memref<3x96xf32, #tpu.memory_space<vmem>>, vector<3x96xf32>
    %c0_7 = arith.constant 0 : index
    %c0_8 = arith.constant 0 : index
    %4 = vector.load %arg6[%c0_7, %c0_8] : memref<96x96xf32, #tpu.memory_space<vmem>>, vector<96x96xf32>
    %c0_9 = arith.constant 0 : index
    %c0_10 = arith.constant 0 : index
    %5 = vector.load %arg8[%c0_9, %c0_10] : memref<96x96xf32, #tpu.memory_space<vmem>>, vector<96x96xf32>
    %c0_11 = arith.constant 0 : index
    %c0_12 = arith.constant 0 : index
    %6 = vector.load %arg10[%c0_11, %c0_12] : memref<96x33xf32, #tpu.memory_space<vmem>>, vector<96x33xf32>
    %cst = arith.constant dense<0.000000e+00> : vector<8x96xf32>
    %7 = tpu.matmul %1, %3, %cst {dimension_numbers = #tpu.dot_dimension_numbers<[1], [0], [0], [1], [0, 0, 1, 1], [], []>} : vector<8x3xf32>, vector<3x96xf32>, vector<8x96xf32> -> vector<8x96xf32>
    %c0_13 = arith.constant 0 : index
    %c0_14 = arith.constant 0 : index
    %8 = vector.load %arg5[%c0_13, %c0_14] : memref<1x96xf32, #tpu.memory_space<vmem>>, vector<1x96xf32>
    %9 = vector.broadcast %8 : vector<1x96xf32> to vector<8x96xf32>
    %10 = arith.addf %7, %9 : vector<8x96xf32>
    %c0_15 = arith.constant 0 : index
    %c0_16 = arith.constant 0 : index
    %11 = vector.load %arg7[%c0_15, %c0_16] : memref<1x96xf32, #tpu.memory_space<vmem>>, vector<1x96xf32>
    %12 = vector.shape_cast %11 : vector<1x96xf32> to vector<1x96xf32>
    %13 = vector.broadcast %12 : vector<1x96xf32> to vector<8x96xf32>
    %c0_17 = arith.constant 0 : index
    %c0_18 = arith.constant 0 : index
    %14 = vector.load %arg9[%c0_17, %c0_18] : memref<1x96xf32, #tpu.memory_space<vmem>>, vector<1x96xf32>
    %15 = vector.shape_cast %14 : vector<1x96xf32> to vector<1x96xf32>
    %16 = vector.broadcast %15 : vector<1x96xf32> to vector<8x96xf32>
    %c0_19 = arith.constant 0 : index
    %c0_20 = arith.constant 0 : index
    %17 = vector.load %arg11[%c0_19, %c0_20] : memref<1x33xf32, #tpu.memory_space<vmem>>, vector<1x33xf32>
    %18 = vector.shape_cast %17 : vector<1x33xf32> to vector<1x33xf32>
    %19 = vector.broadcast %18 : vector<1x33xf32> to vector<8x33xf32>
    %cst_21 = arith.constant dense<0.000000e+00> : vector<8x96xf32>
    %20 = tpu.matmul %0, %2, %cst_21 {dimension_numbers = #tpu.dot_dimension_numbers<[1], [0], [0], [1], [0, 0, 1, 1], [], []>} : vector<8x33xf32>, vector<33x96xf32>, vector<8x96xf32> -> vector<8x96xf32>
    %21 = arith.addf %20, %10 : vector<8x96xf32>
    %22 = math.tanh %21 : vector<8x96xf32>
    %cst_22 = arith.constant dense<0.000000e+00> : vector<8x96xf32>
    %23 = tpu.matmul %22, %4, %cst_22 {dimension_numbers = #tpu.dot_dimension_numbers<[1], [0], [0], [1], [0, 0, 1, 1], [], []>} : vector<8x96xf32>, vector<96x96xf32>, vector<8x96xf32> -> vector<8x96xf32>
    %24 = arith.addf %23, %13 : vector<8x96xf32>
    %25 = math.tanh %24 : vector<8x96xf32>
    %cst_23 = arith.constant dense<0.000000e+00> : vector<8x96xf32>
    %26 = tpu.matmul %25, %5, %cst_23 {dimension_numbers = #tpu.dot_dimension_numbers<[1], [0], [0], [1], [0, 0, 1, 1], [], []>} : vector<8x96xf32>, vector<96x96xf32>, vector<8x96xf32> -> vector<8x96xf32>
    %27 = arith.addf %26, %16 : vector<8x96xf32>
    %28 = math.tanh %27 : vector<8x96xf32>
    %cst_24 = arith.constant dense<0.000000e+00> : vector<8x33xf32>
    %29 = tpu.matmul %28, %6, %cst_24 {dimension_numbers = #tpu.dot_dimension_numbers<[1], [0], [0], [1], [0, 0, 1, 1], [], []>} : vector<8x96xf32>, vector<96x33xf32>, vector<8x33xf32> -> vector<8x33xf32>
    %30 = arith.addf %29, %19 : vector<8x33xf32>
    %cst_25 = arith.constant 5.000000e-01 : f32
    %31 = vector.broadcast %cst_25 : f32 to vector<8x33xf32>
    %32 = arith.mulf %31, %30 : vector<8x33xf32>
    %33 = arith.addf %0, %32 : vector<8x33xf32>
    %cst_26 = arith.constant dense<0.000000e+00> : vector<8x96xf32>
    %34 = tpu.matmul %33, %2, %cst_26 {dimension_numbers = #tpu.dot_dimension_numbers<[1], [0], [0], [1], [0, 0, 1, 1], [], []>} : vector<8x33xf32>, vector<33x96xf32>, vector<8x96xf32> -> vector<8x96xf32>
    %35 = arith.addf %34, %10 : vector<8x96xf32>
    %36 = math.tanh %35 : vector<8x96xf32>
    %cst_27 = arith.constant dense<0.000000e+00> : vector<8x96xf32>
    %37 = tpu.matmul %36, %4, %cst_27 {dimension_numbers = #tpu.dot_dimension_numbers<[1], [0], [0], [1], [0, 0, 1, 1], [], []>} : vector<8x96xf32>, vector<96x96xf32>, vector<8x96xf32> -> vector<8x96xf32>
    %38 = arith.addf %37, %13 : vector<8x96xf32>
    %39 = math.tanh %38 : vector<8x96xf32>
    %cst_28 = arith.constant dense<0.000000e+00> : vector<8x96xf32>
    %40 = tpu.matmul %39, %5, %cst_28 {dimension_numbers = #tpu.dot_dimension_numbers<[1], [0], [0], [1], [0, 0, 1, 1], [], []>} : vector<8x96xf32>, vector<96x96xf32>, vector<8x96xf32> -> vector<8x96xf32>
    %41 = arith.addf %40, %16 : vector<8x96xf32>
    %42 = math.tanh %41 : vector<8x96xf32>
    %cst_29 = arith.constant dense<0.000000e+00> : vector<8x33xf32>
    %43 = tpu.matmul %42, %6, %cst_29 {dimension_numbers = #tpu.dot_dimension_numbers<[1], [0], [0], [1], [0, 0, 1, 1], [], []>} : vector<8x96xf32>, vector<96x33xf32>, vector<8x33xf32> -> vector<8x33xf32>
    %44 = arith.addf %43, %19 : vector<8x33xf32>
    %cst_30 = arith.constant 5.000000e-01 : f32
    %45 = vector.broadcast %cst_30 : f32 to vector<8x33xf32>
    %46 = arith.mulf %45, %44 : vector<8x33xf32>
    %47 = arith.addf %33, %46 : vector<8x33xf32>
    %c0_31 = arith.constant 0 : index
    %c0_32 = arith.constant 0 : index
    %48 = vector.load %arg12[%c0_31, %c0_32] : memref<8x33xf32, #tpu.memory_space<vmem>>, vector<8x33xf32>
    tpu.vector_store %arg12[%c0_31, %c0_32], %47 {strides = array<i32>} : memref<8x33xf32, #tpu.memory_space<vmem>>, vector<8x33xf32>,
    return
  }
  func.func @transform_0(%arg0: i32) -> (i32, i32) {
    %c0_i32 = arith.constant 0 : i32
    %c0_i32_0 = arith.constant 0 : i32
    return %arg0, %c0_i32 : i32, i32
  }
  func.func @transform_1(%arg0: i32) -> (i32, i32) {
    %c0_i32 = arith.constant 0 : i32
    %c0_i32_0 = arith.constant 0 : i32
    return %arg0, %c0_i32 : i32, i32
  }
  func.func @transform_2(%arg0: i32) -> (i32, i32) {
    %c0_i32 = arith.constant 0 : i32
    %c0_i32_0 = arith.constant 0 : i32
    %c0_i32_1 = arith.constant 0 : i32
    return %c0_i32, %c0_i32_0 : i32, i32
  }
  func.func @transform_3(%arg0: i32) -> (i32, i32) {
    %c0_i32 = arith.constant 0 : i32
    %c0_i32_0 = arith.constant 0 : i32
    %c0_i32_1 = arith.constant 0 : i32
    return %c0_i32, %c0_i32_0 : i32, i32
  }
  func.func @transform_4(%arg0: i32) -> (i32, i32) {
    %c0_i32 = arith.constant 0 : i32
    %c0_i32_0 = arith.constant 0 : i32
    %c0_i32_1 = arith.constant 0 : i32
    return %c0_i32, %c0_i32_0 : i32, i32
  }
  func.func @transform_5(%arg0: i32) -> (i32, i32) {
    %c0_i32 = arith.constant 0 : i32
    %c0_i32_0 = arith.constant 0 : i32
    %c0_i32_1 = arith.constant 0 : i32
    return %c0_i32, %c0_i32_0 : i32, i32
  }
  func.func @transform_6(%arg0: i32) -> (i32, i32) {
    %c0_i32 = arith.constant 0 : i32
    %c0_i32_0 = arith.constant 0 : i32
    %c0_i32_1 = arith.constant 0 : i32
    return %c0_i32, %c0_i32_0 : i32, i32
  }
  func.func @transform_7(%arg0: i32) -> (i32, i32) {
    %c0_i32 = arith.constant 0 : i32
    %c0_i32_0 = arith.constant 0 : i32
    %c0_i32_1 = arith.constant 0 : i32
    return %c0_i32, %c0_i32_0 : i32, i32
  }
  func.func @transform_8(%arg0: i32) -> (i32, i32) {
    %c0_i32 = arith.constant 0 : i32
    %c0_i32_0 = arith.constant 0 : i32
    %c0_i32_1 = arith.constant 0 : i32
    return %c0_i32, %c0_i32_0 : i32, i32
  }
  func.func @transform_9(%arg0: i32) -> (i32, i32) {
    %c0_i32 = arith.constant 0 : i32
    %c0_i32_0 = arith.constant 0 : i32
    %c0_i32_1 = arith.constant 0 : i32
    return %c0_i32, %c0_i32_0 : i32, i32
  }
  func.func @transform_10(%arg0: i32) -> (i32, i32) {
    %c0_i32 = arith.constant 0 : i32
    %c0_i32_0 = arith.constant 0 : i32
    %c0_i32_1 = arith.constant 0 : i32
    return %c0_i32, %c0_i32_0 : i32, i32
  }
  func.func @transform_11(%arg0: i32) -> (i32, i32) {
    %c0_i32 = arith.constant 0 : i32
    %c0_i32_0 = arith.constant 0 : i32
    return %arg0, %c0_i32 : i32, i32
  }
}

</mosaic_0001>

<bundles_post_ra>
// kernel: tile.9
= control target key start
LH: loop header
LB: loop body
LE: loop exit
PB: predicated region body
PF: predicated region fallthrough
CT: control target
= control target key end

     0   :  { %vm42_vm0 = vcmask 1047556   ;;  %vm44_vm1 = vcmask 89088   ;;  %s82_s24 = smov 11   ;;  %vm54_vm2 = vcmask 269488   ;;  %vm64_vm3 = vcmask 179288   ;;  %s126_s0 = inlined_call_operand.vmem [shape: f32[8,3,11], index: 0, kind: input, shape index: {}]   ;;  %s127_s1 = inlined_call_operand.vmem [shape: f32[8,33], index: 1, kind: output, shape index: {}]  }
   0x1   :  { %v72_v0 = vld [vmem:[%s126_s0 + $0x1c] sm:$0xf]  ;;  %v73_v1 = vld [vmem:[%s126_s0 + $0x18] sm:$0xf]  ;;  %v74_v2 = vld [vmem:[%s126_s0 + $0x14] sm:$0xf] }
   0x2   :  { %8 = vst [vmem:[#allocation0 + $0x38] sm:$0xf] %v72_v0  ;;  %13 = vst [vmem:[#allocation0 + $0x30] sm:$0xf] %v73_v1  ;;  %v75_v3 = vld [vmem:[%s126_s0 + $0x10] sm:$0xf] }
   0x3   :  { %18 = vst [vmem:[#allocation0 + $0x28] sm:$0xf] %v74_v2  ;;  %v76_v4 = vld [vmem:[%s126_s0 + $0xc] sm:$0xf]  ;;  %v77_v5 = vld [vmem:[%s126_s0 + $0x8] sm:$0xf] }
   0x4   :  { %23 = vst [vmem:[#allocation0 + $0x20] sm:$0xf] %v75_v3  ;;  %28 = vst [vmem:[#allocation0 + $0x18] sm:$0xf] %v76_v4  ;;  %v78_v6 = vld [vmem:[%s126_s0 + $0x4] sm:$0xf] }
   0x5   :  { %33 = vst [vmem:[#allocation0 + $0x10] sm:$0xf] %v77_v5  ;;  %v38_v7 = vld [vmem:[%s126_s0] sm:$0xf]  ;;  %37 = vst [vmem:[#allocation0 + $0x8] sm:$0xf] %v78_v6 }
   0x6   :  { %39 = vst [vmem:[#allocation0] sm:$0xf] %v38_v7  ;;  %s81_s0 = smov 22  }
   0xb   :  { %v49_v8 = vld [vmem:[#allocation0 + $0x2] ss:$8 sm:$0xf0]   ;;  %v41_v9 = vld [vmem:[#allocation0] ss:$8 sm:$0xf0]  }
   0xc   :  { %v59_v15 = vld [vmem:[#allocation0 + $0x1] ss:$8 sm:$0xf0]  }
   0xd   :  { %v40_v10 = vld [vmem:[#allocation0] ss:$8 sm:$0xf]   ;;  %v47_v11 = vld [vmem:[#allocation0 + $0x2] ss:$8 sm:$0xf]  }
   0xe   :  { %v51_v12 = vsel %vm42_vm0, %v49_v8, %v47_v11  ;;  %v43_v13 = vsel %vm42_vm0, %v41_v9, %v40_v10  ;;  %v57_v14 = vld [vmem:[#allocation0 + $0x1] ss:$8 sm:$0xf]  }
   0xf   :  { %52 = vrot.lane.b32.xlu0 %v51_v12, %s81_s0  ;;  %45 = vst.msk [vmem:[%s127_s1] sm:$0xff] %vm44_vm1, %v43_v13   ;;  %v61_v16 = vsel %vm42_vm0, %v59_v15, %v57_v14 }
  0x13   :  { %62 = vrot.lane.b32.xlu0 %v61_v16, %s82_s24 }
  0x81   :  { %v53_v17 = vpop.permute.xlu0 %52  }
  0x82   :  { %55 = vst.msk [vmem:[%s127_s1] sm:$0xff] %vm54_vm2, %v53_v17  }
  0x85   :  { %v63_v18 = vpop.permute.xlu0 %62  }
  0x86   :  { %65 = vst.msk [vmem:[%s127_s1] sm:$0xff] %vm64_vm3, %v63_v18  }

// kernel: state_predictor_forward.1
= control target key start
LH: loop header
LB: loop body
LE: loop exit
PB: predicated region body
PF: predicated region fallthrough
CT: control target
= control target key end

     0   :  { %16 = vsyncpa [#allocation3], 0  ;;  %s1271_s17 = smov [#allocation2]   ;;  %s1645_s0 = inlined_call_operand.vmem [shape: f32[8,33], index: 0, kind: input, shape index: {}]   ;;  %s1646_s1 = inlined_call_operand.vmem [shape: f32[8,3], index: 1, kind: input, shape index: {}]   ;;  %s1647_s2 = inlined_call_operand.hbm [shape: f32[33,96], index: 2, kind: input, shape index: {}]   ;;  %s1648_s3 = inlined_call_operand.vmem [shape: f32[3,96], index: 3, kind: input, shape index: {}]   ;;  %s1649_s4 = inlined_call_operand.vmem [shape: f32[1,96], index: 4, kind: input, shape index: {}]   ;;  %s1650_s5 = inlined_call_operand.vmem [shape: f32[96,96], index: 5, kind: input, shape index: {}]   ;;  %s1651_s6 = inlined_call_operand.vmem [shape: f32[1,96], index: 6, kind: input, shape index: {}]   ;;  %s1652_s7 = inlined_call_operand.vmem [shape: f32[96,96], index: 7, kind: input, shape index: {}]   ;;  %s1653_s8 = inlined_call_operand.vmem [shape: f32[1,96], index: 8, kind: input, shape index: {}]   ;;  %s1654_s9 = inlined_call_operand.vmem [shape: f32[96,33], index: 9, kind: input, shape index: {}]   ;;  %s1655_s10 = inlined_call_operand.vmem [shape: f32[1,33], index: 10, kind: input, shape index: {}]   ;;  %s1656_s11 = inlined_call_operand.vmem [shape: f32[8,33], index: 11, kind: output, shape index: {}]  }
   0x1   :  { %s26_s18 = sshll.u32 %s1271_s17, 4  ;;  %s1247_s21 = scalar_lea.hbm %s1647_s2, 640  ;;  %s27_s18 = int_to_ptr.vmem [resolvable:$true] %s26_s18 }
   0x2   :  { %p1248_p0 = scmp.ne.s32.totalorder %s1647_s2, %s1247_s21  ;;  %p1251_p1 = scmp.lt.u32.totalorder %s1247_s21, %s1647_s2 }
   0x4   :  { %p1253_p2 = pnand %p1251_p1, %p1248_p0 }
   0x6   :  { %1256 = shalt.err (!%p1253_p2)
}
   0x7   :  { %s1257_s26 = scalar_lea.vmem %s27_s18, 640  ;;  %p1262_p4 = scmp.lt.s32.totalorder %s27_s18, %s27_s18 }
   0x8   :  { %p1258_p3 = scmp.ne.s32.totalorder %s27_s18, %s1257_s26  ;;  %p1263_p5 = scmp.lt.s32.totalorder %s1257_s26, %s1257_s26 }
   0xa   :  { %p1264_p6 = por %p1263_p5, %p1262_p4 }
   0xc   :  { %p1265_p7 = pnand %p1264_p6, %p1258_p3 }
   0xe   :  { %1268 = shalt.err (!%p1265_p7)
}
   0xf   :  { %s1272_s27 = smov 128   ;;  %s1273_s28 = smov 8  }
  0x10   :  { %32 = dma.hbm_to_vmem [thread:$0]  %s1647_s2, 640, %s27_s18, [#allocation3], %s1272_s27, %s1272_s27, %s1273_s28  }
  0x11   :  { %1269 = dma.done.wait [#allocation3], 640  }
  0x12   :  { %1270 = vsyncadd [#allocation3], 4294966656  ;;  %v1274_v0 = vmov 0.0   ;;  %vm1275_vm0 = vmmov 0   ;;  %v1276_v1 = vmov 0.0|0.0   ;;  %vm107_vm1 = vcmask 1042432  }
  0x13   :  { %916 = vmatprep.subr.mxu0 %v1274_v0  ;;  %918 = vmatprep.mubr.msk.f32.mxu0 %vm1275_vm0, %v1274_v0  ;;  %vm103_vm2 = vcmask 23552   ;;  %v59_v2 = vld [vmem:[%s1648_s3] sm:$0x7]  ;;  %v55_v5 = vld [vmem:[#allocation2 + $0x8] sm:$0xff]  ;;  %v56_v6 = vld [vmem:[#allocation2 + $0x10] sm:$0xff]  ;;  %vm206_vm3 = vcmask 1040384  }
  0x14   :  { %1133 = vmatprep.subr.bf16.mxu1 %v1276_v1  ;;  %985 = vmatprep.mubr.msk.f32.mxu1 %vm1275_vm0, %v1274_v0  ;;  %v53_v3 = vld [vmem:[%s1646_s1] sm:$0xff]  ;;  %v57_v7 = vld [vmem:[#allocation2 + $0x18] sm:$0xff]  ;;  %vm202_vm4 = vcmask 269312   ;;  %v61_v13 = vld [vmem:[%s1650_s5 + $0x8] sm:$0xff]  ;;  %vm281_vm5 = vcmask 785408  }
  0x15   :  { %v54_v4 = vld [vmem:[#allocation2] sm:$0xff]  ;;  %917 = vmatpush3.msk.msra.mxu0 %vm107_vm1, %v59_v2  ;;  %v1367_v9 = vpack.c.bf16 %v57_v7, %v56_v6  ;;  %v62_v15 = vld [vmem:[%s1650_s5 + $0x10] sm:$0xff]  ;;  %v63_v16 = vld [vmem:[%s1650_s5 + $0x18] sm:$0xff] }
  0x16   :  { %919 = vmatmul.mubr.msk.f32.vlgmr.msra.gmra.mrb[0].mxu0 %vm103_vm2, %v53_v3  ;;  %1109 = vmatprep.subr.bf16.mxu0 %v1276_v1  ;;  %v1362_v8 = vpack.c.bf16 %v55_v5, %v54_v4  ;;  %v1372_v10 = vld [vmem:[#allocation2 + $0x20] sm:$0x1]  ;;  %v1401_v17 = vpack.c.bf16 %v63_v16, %v62_v15  ;;  %v65_v19 = vld [vmem:[%s1650_s5 + $0x28] sm:$0xff]  ;;  %v66_v21 = vld [vmem:[%s1650_s5 + $0x30] sm:$0xff] }
  0x17   :  { %931 = vmatprep.mubr.msk.f32.mxu0 %vm1275_vm0, %v1274_v0  ;;  %v1377_v11 = vld [vmem:[%s1645_s0] sm:$0xff]  ;;  %v67_v22 = vld [vmem:[%s1650_s5 + $0x38] sm:$0xff]  ;;  %v69_v25 = vld [vmem:[%s1650_s5 + $0x48] sm:$0xff] }
  0x18   :  { %1111 = vmatpush3.bf16.msra.mxu0 %v1362_v8  ;;  %v60_v12 = vld [vmem:[%s1650_s5] sm:$0xff]  ;;  %v1422_v23 = vpack.c.bf16 %v67_v22, %v66_v21  ;;  %v70_v27 = vld [vmem:[%s1650_s5 + $0x50] sm:$0xff]  ;;  %v71_v28 = vld [vmem:[%s1650_s5 + $0x58] sm:$0xff] }
  0x19   :  { %1112 = vmatprep.subr.bf16.mxu0 %v1276_v1  ;;  %v1392_v14 = vpack.c.bf16 %v61_v13, %v60_v12  ;;  %v64_v18 = vld [vmem:[%s1650_s5 + $0x20] sm:$0xff]  ;;  %v1441_v29 = vpack.c.bf16 %v71_v28, %v70_v27  ;;  %v73_v31 = vld [vmem:[%s1652_s7 + $0x8] sm:$0xff]  ;;  %v74_v32 = vld [vmem:[%s1652_s7 + $0x10] sm:$0xff] }
  0x1a   :  { %v1411_v20 = vpack.c.bf16 %v65_v19, %v64_v18  ;;  %v68_v24 = vld [vmem:[%s1650_s5 + $0x40] sm:$0xff]  ;;  %v75_v34 = vld [vmem:[%s1652_s7 + $0x18] sm:$0xff]  ;;  %v77_v37 = vld [vmem:[%s1652_s7 + $0x28] sm:$0xff] }
  0x1b   :  { %v1432_v26 = vpack.c.bf16 %v69_v25, %v68_v24  ;;  %v72_v30 = vld [vmem:[%s1652_s7] sm:$0xff]  ;;  %v1461_v35 = vpack.c.bf16 %v75_v34, %v74_v32  ;;  %v78_v47 = vld [vmem:[%s1652_s7 + $0x30] sm:$0xff]  ;;  %v79_v48 = vld [vmem:[%s1652_s7 + $0x38] sm:$0xff] }
  0x1c   :  { %1114 = vmatpush3.bf16.msra.mxu0 %v1367_v9  ;;  %v1455_v33 = vpack.c.bf16 %v73_v31, %v72_v30  ;;  %v76_v36 = vld [vmem:[%s1652_s7 + $0x20] sm:$0xff]  ;;  %v1491_v49 = vpack.c.bf16 %v79_v48, %v78_v47  ;;  %v81_v51 = vld [vmem:[%s1652_s7 + $0x48] sm:$0xff]  ;;  %v82_v53 = vld [vmem:[%s1652_s7 + $0x50] sm:$0xff] }
  0x1d   :  { %929 = vmatprep.subr.mxu0 %v1274_v0  ;;  %v1471_v38 = vpack.c.bf16 %v77_v37, %v76_v36  ;;  %v808_v41 = vld [vmem:[%s1649_s4] ss:$0 sm:$0xff]  ;;  %v83_v54 = vld [vmem:[%s1652_s7 + $0x58] sm:$0xff]  ;;  %v85_v57 = vld [vmem:[%s1654_s9 + $0x8] sm:$0xff] }
  0x1e   :  { %1135 = vmatpush3.bf16.msra.mxu1 %v1455_v33  ;;  %v80_v50 = vld [vmem:[%s1652_s7 + $0x40] sm:$0xff]  ;;  %v1510_v55 = vpack.c.bf16 %v83_v54, %v82_v53  ;;  %v86_v58 = vld [vmem:[%s1654_s9 + $0x10] sm:$0xff]  ;;  %v87_v60 = vld [vmem:[%s1654_s9 + $0x18] sm:$0xff] }
  0x1f   :  { %1136 = vmatprep.subr.bf16.mxu1 %v1276_v1  ;;  %v1501_v52 = vpack.c.bf16 %v81_v51, %v80_v50  ;;  %v84_v56 = vld [vmem:[%s1654_s9] sm:$0xff]  ;;  %v1530_v61 = vpack.c.bf16 %v87_v60, %v86_v58  ;;  %v89_v63 = vld [vmem:[%s1654_s9 + $0x28] sm:$0xff]  ;;  %v90_v12 = vld [vmem:[%s1654_s9 + $0x30] sm:$0xff] }
  0x20   :  { %930 = vmatpush3.msk.msra.mxu0 %vm206_vm3, %v1372_v10  ;;  %v1524_v59 = vpack.c.bf16 %v85_v57, %v84_v56  ;;  %v88_v62 = vld [vmem:[%s1654_s9 + $0x20] sm:$0xff]  ;;  %v94_v16 = vld [vmem:[%s1654_s9 + $0x50] sm:$0xff]  ;;  %v95_v18 = vld [vmem:[%s1654_s9 + $0x58] sm:$0xff] }
  0x21   :  { %932 = vmatmul.mubr.msk.f32.vlgmr.msra.gmra.mrb[2].mxu0 %vm202_vm4, %v1377_v11  ;;  %1115 = vmatprep.subr.bf16.mxu0 %v1276_v1  ;;  %v1540_v2 = vpack.c.bf16 %v89_v63, %v88_v62  ;;  %v1548_v3 = vld [vmem:[%s1651_s6] ss:$0 sm:$0xff]  ;;  %v1167_v19 = vpack.c.bf16 %v95_v18, %v94_v16 }
  0x22   :  { %958 = vmatprep.mubr.msk.f32.mxu0 %vm1275_vm0, %v1274_v0  ;;  %1117 = vmatpush3.bf16.msra.mxu0 %v1392_v14  ;;  %v1588_v21 = vld [vmem:[%s1653_s8] ss:$0 sm:$0xff] }
  0x23   :  { %1118 = vmatprep.subr.bf16.mxu0 %v1276_v1  ;;  %1138 = vmatpush3.bf16.msra.mxu1 %v1461_v35  ;;  %v813_v28 = vld [vmem:[%s1655_s10] ss:$0 sm:$0xff] }
  0x24   :  { %1139 = vmatprep.subr.bf16.mxu1 %v1276_v1 }
  0x26   :  { %1120 = vmatpush3.bf16.msra.mxu0 %v1401_v17 }
  0x27   :  { %1121 = vmatprep.subr.bf16.mxu0 %v1276_v1  ;;  %1141 = vmatpush3.bf16.msra.mxu1 %v1471_v38 }
  0x28   :  { %1142 = vmatprep.subr.bf16.mxu1 %v1276_v1 }
  0x2a   :  { %1123 = vmatpush3.bf16.msra.mxu0 %v1411_v20 }
  0x2b   :  { %1124 = vmatprep.subr.bf16.mxu0 %v1276_v1  ;;  %1144 = vmatpush3.bf16.msra.mxu1 %v1491_v49 }
  0x2c   :  { %1145 = vmatprep.subr.bf16.mxu1 %v1276_v1 }
  0x2e   :  { %1126 = vmatpush3.bf16.msra.mxu0 %v1422_v23 }
  0x2f   :  { %1127 = vmatprep.subr.bf16.mxu0 %v1276_v1  ;;  %1147 = vmatpush3.bf16.msra.mxu1 %v1501_v52 }
  0x30   :  { %1148 = vmatprep.subr.bf16.mxu1 %v1276_v1 }
  0x32   :  { %1129 = vmatpush3.bf16.msra.mxu0 %v1432_v26 }
  0x33   :  { %1130 = vmatprep.subr.bf16.mxu0 %v1276_v1  ;;  %1150 = vmatpush3.bf16.msra.mxu1 %v1510_v55 }
  0x34   :  { %1169 = vmatprep.subr.bf16.mxu1 %v1276_v1 }
  0x36   :  { %1132 = vmatpush3.bf16.msra.mxu0 %v1441_v29 }
  0x37   :  { %1151 = vmatprep.subr.bf16.mxu0 %v1276_v1 }
  0xe9   :  { %v177_v39 = vpop.f32.mrb[0].mxu0 }
  0xea   :  { %v920_v40 = vpop.f32.mrb[1].mxu0  ;;  %v1479_v42 = vadd.f32 %v808_v41, %v177_v39 }
  0xf4   :  { %v276_v43 = vpop.f32.mrb[2].mxu0 }
  0xf5   :  { %v277_v44 = vadd.f32 %v276_v43, %v1479_v42  ;;  %v933_v45 = vpop.f32.mrb[3].mxu0 }
  0xf7   :  { %1235 = vtanh.f32 %v277_v44 }
 0x101   :  { %v1236_v46 = vpop.eup %1235 }
 0x102   :  { %959 = vmatmul.mubr.msk.f32.vlgmr.msra.gmra.mrb[4].mxu0 %vm281_vm5, %v1236_v46 }
 0x103   :  { %1012 = vmatprep.mubr.msk.f32.mxu0 %vm1275_vm0, %v1274_v0  ;;  %1153 = vmatpush3.bf16.msra.mxu0 %v1524_v59 }
 0x104   :  { %1154 = vmatprep.subr.bf16.mxu0 %v1276_v1 }
 0x107   :  { %1156 = vmatpush3.bf16.msra.mxu0 %v1530_v61 }
 0x108   :  { %1157 = vmatprep.subr.bf16.mxu0 %v1276_v1 }
 0x10b   :  { %1159 = vmatpush3.bf16.msra.mxu0 %v1540_v2 }
 0x10c   :  { %1160 = vmatprep.subr.bf16.mxu0 %v1276_v1 }
 0x1d5   :  { %v351_v4 = vpop.f32.mrb[4].mxu0 }
 0x1d6   :  { %v352_v5 = vadd.f32 %v1548_v3, %v351_v4  ;;  %v960_v6 = vpop.f32.mrb[5].mxu0 }
 0x1d8   :  { %1237 = vtanh.f32 %v352_v5 }
 0x1e2   :  { %v1238_v7 = vpop.eup %1237 }
 0x1e3   :  { %986 = vmatmul.mubr.msk.f32.vlgmr.msra.gmra.mrb[0].mxu1 %vm281_vm5, %v1238_v7 }
 0x1e4   :  { %1171 = vmatpush3.bf16.msra.mxu1 %v1362_v8  ;;  %1025 = vmatprep.mubr.msk.f32.mxu1 %vm1275_vm0, %v1274_v0  ;;  %v91_v8 = vld [vmem:[%s1654_s9 + $0x38] sm:$0xff] }
 0x1e5   :  { %1172 = vmatprep.subr.bf16.mxu1 %v1276_v1  ;;  %v1567_v13 = vpack.c.bf16 %v91_v8, %v90_v12 }
 0x1e7   :  { %1162 = vmatpush3.bf16.msra.mxu0 %v1567_v13 }
 0x1e8   :  { %1174 = vmatpush3.bf16.msra.mxu1 %v1367_v9  ;;  %v92_v9 = vld [vmem:[%s1654_s9 + $0x40] sm:$0xff]  ;;  %1163 = vmatprep.subr.bf16.mxu0 %v1276_v1 }
 0x1e9   :  { %1023 = vmatprep.subr.mxu1 %v1274_v0 }
 0x1ec   :  { %1024 = vmatpush3.msk.msra.mxu1 %vm206_vm3, %v1372_v10  ;;  %v93_v10 = vld [vmem:[%s1654_s9 + $0x48] sm:$0xff] }
 0x1ed   :  { %1175 = vmatprep.subr.bf16.mxu1 %v1276_v1  ;;  %v1164_v15 = vpack.c.bf16 %v93_v10, %v92_v9 }
 0x1ef   :  { %1165 = vmatpush3.bf16.msra.mxu0 %v1164_v15 }
 0x1f0   :  { %1166 = vmatprep.subr.bf16.mxu0 %v1276_v1 }
 0x1f3   :  { %1168 = vmatpush3.bf16.msra.mxu0 %v1167_v19 }
 0x1f4   :  { %1193 = vmatprep.subr.bf16.mxu0 %v1276_v1 }
 0x2b6   :  { %v425_v22 = vpop.f32.mrb[0].mxu1 }
 0x2b7   :  { %v426_v24 = vadd.f32 %v1588_v21, %v425_v22  ;;  %v987_v25 = vpop.f32.mrb[1].mxu1 }
 0x2b9   :  { %1239 = vtanh.f32 %v426_v24 }
 0x2c3   :  { %v1240_v27 = vpop.eup %1239 }
 0x2c4   :  { %1013 = vmatmul.mubr.msk.f32.vlgmr.msra.gmra.mrb[6].mxu0 %vm281_vm5, %v1240_v27 }
 0x2c5   :  { %1195 = vmatpush3.bf16.msra.mxu0 %v1455_v33  ;;  %1079 = vmatprep.mubr.msk.f32.mxu0 %vm1275_vm0, %v1274_v0 }
 0x2c6   :  { %1196 = vmatprep.subr.bf16.mxu0 %v1276_v1 }
 0x2c9   :  { %1198 = vmatpush3.bf16.msra.mxu0 %v1461_v35 }
 0x2ca   :  { %1199 = vmatprep.subr.bf16.mxu0 %v1276_v1 }
 0x2cd   :  { %1201 = vmatpush3.bf16.msra.mxu0 %v1471_v38 }
 0x2ce   :  { %1202 = vmatprep.subr.bf16.mxu0 %v1276_v1 }
 0x2d1   :  { %1204 = vmatpush3.bf16.msra.mxu0 %v1491_v49 }
 0x2d2   :  { %1205 = vmatprep.subr.bf16.mxu0 %v1276_v1 }
 0x2d5   :  { %1207 = vmatpush3.bf16.msra.mxu0 %v1501_v52 }
 0x2d6   :  { %1208 = vmatprep.subr.bf16.mxu0 %v1276_v1 }
 0x2d9   :  { %1210 = vmatpush3.bf16.msra.mxu0 %v1510_v55 }
 0x397   :  { %v499_v30 = vpop.f32.mrb[6].mxu0 }
 0x398   :  { %v500_v31 = vadd.f32 %v813_v28, %v499_v30  ;;  %v1014_v32 = vpop.f32.mrb[7].mxu0 }
 0x39a   :  { %v503_v33 = vmul.f32 0.5, %v500_v31 }
 0x39c   :  { %v504_v34 = vadd.f32 %v503_v33, %v1377_v11 }
 0x39e   :  { %1026 = vmatmul.mubr.msk.f32.vlgmr.msra.gmra.mrb[2].mxu1 %vm202_vm4, %v504_v34 }
 0x39f   :  { %1177 = vmatpush3.bf16.msra.mxu1 %v1392_v14  ;;  %1052 = vmatprep.mubr.msk.f32.mxu1 %vm1275_vm0, %v1274_v0 }
 0x3a0   :  { %1178 = vmatprep.subr.bf16.mxu1 %v1276_v1 }
 0x3a3   :  { %1180 = vmatpush3.bf16.msra.mxu1 %v1401_v17 }
 0x3a4   :  { %1181 = vmatprep.subr.bf16.mxu1 %v1276_v1 }
 0x3a7   :  { %1183 = vmatpush3.bf16.msra.mxu1 %v1411_v20 }
 0x3a8   :  { %1184 = vmatprep.subr.bf16.mxu1 %v1276_v1 }
 0x3ab   :  { %1186 = vmatpush3.bf16.msra.mxu1 %v1422_v23 }
 0x3ac   :  { %1187 = vmatprep.subr.bf16.mxu1 %v1276_v1 }
 0x3af   :  { %1189 = vmatpush3.bf16.msra.mxu1 %v1432_v26 }
 0x3b0   :  { %1190 = vmatprep.subr.bf16.mxu1 %v1276_v1 }
 0x3b3   :  { %1192 = vmatpush3.bf16.msra.mxu1 %v1441_v29 }
 0x3b4   :  { %1211 = vmatprep.subr.bf16.mxu1 %v1276_v1 }
 0x471   :  { %v574_v11 = vpop.f32.mrb[2].mxu1 }
 0x472   :  { %v575_v14 = vadd.f32 %v574_v11, %v1479_v42  ;;  %v1027_v17 = vpop.f32.mrb[3].mxu1 }
 0x474   :  { %1241 = vtanh.f32 %v575_v14 }
 0x47e   :  { %v1242_v20 = vpop.eup %1241 }
 0x47f   :  { %1053 = vmatmul.mubr.msk.f32.vlgmr.msra.gmra.mrb[4].mxu1 %vm281_vm5, %v1242_v20 }
 0x480   :  { %1213 = vmatpush3.bf16.msra.mxu1 %v1524_v59  ;;  %1106 = vmatprep.mubr.msk.f32.mxu1 %vm1275_vm0, %v1274_v0 }
 0x481   :  { %1214 = vmatprep.subr.bf16.mxu1 %v1276_v1 }
 0x484   :  { %1216 = vmatpush3.bf16.msra.mxu1 %v1530_v61 }
 0x485   :  { %1217 = vmatprep.subr.bf16.mxu1 %v1276_v1 }
 0x488   :  { %1219 = vmatpush3.bf16.msra.mxu1 %v1540_v2 }
 0x489   :  { %1220 = vmatprep.subr.bf16.mxu1 %v1276_v1 }
 0x48c   :  { %1222 = vmatpush3.bf16.msra.mxu1 %v1567_v13 }
 0x48d   :  { %1223 = vmatprep.subr.bf16.mxu1 %v1276_v1 }
 0x490   :  { %1225 = vmatpush3.bf16.msra.mxu1 %v1164_v15 }
 0x491   :  { %1226 = vmatprep.subr.bf16.mxu1 %v1276_v1 }
 0x494   :  { %1228 = vmatpush3.bf16.msra.mxu1 %v1167_v19 }
 0x552   :  { %v648_v23 = vpop.f32.mrb[4].mxu1 }
 0x553   :  { %v649_v0 = vadd.f32 %v1548_v3, %v648_v23  ;;  %v1054_v26 = vpop.f32.mrb[5].mxu1 }
 0x555   :  { %1243 = vtanh.f32 %v649_v0 }
 0x55f   :  { %v1244_v29 = vpop.eup %1243 }
 0x560   :  { %1080 = vmatmul.mubr.msk.f32.vlgmr.msra.gmra.mrb[8].mxu0 %vm281_vm5, %v1244_v29 }
 0x633   :  { %v722_v35 = vpop.f32.mrb[8].mxu0 }
 0x634   :  { %v723_v36 = vadd.f32 %v1588_v21, %v722_v35  ;;  %v1081_v37 = vpop.f32.mrb[9].mxu0 }
 0x636   :  { %1245 = vtanh.f32 %v723_v36 }
 0x640   :  { %v1246_v38 = vpop.eup %1245 }
 0x641   :  { %1107 = vmatmul.mubr.msk.f32.vlgmr.msra.gmra.mrb[6].mxu1 %vm281_vm5, %v1246_v38 }
 0x714   :  { %v796_v39 = vpop.f32.mrb[6].mxu1 }
 0x715   :  { %v797_v40 = vadd.f32 %v813_v28, %v796_v39  ;;  %v1108_v1 = vpop.f32.mrb[7].mxu1 }
 0x717   :  { %v800_v41 = vmul.f32 0.5, %v797_v40 }
 0x719   :  { %v801_v42 = vadd.f32 %v800_v41, %v504_v34 }
 0x71b   :  { %802 = vst.msk [vmem:[%s1656_s11] sm:$0xff] %vm202_vm4, %v801_v42 }
 0x71c   :  { %807 = vsyncpa [#allocation3], 1 }

</bundles_post_ra>
